<compile_context>
chip_gen: v6e
topology: v6e:2x2x1
jax: 0.10.0
libtpu: 0.0.40
codegen_flags: <defaults>
</compile_context>

<pallas_src>
import numpy as np
import jax
import jax.numpy as jnp
from jax import lax
from jax.experimental import pallas as pl
from jax.experimental.pallas import tpu as pltpu

EPS = 1e-07


def _round_up(x, m):
    return ((x + m - 1) // m) * m


# --------------------------------------------------------------------------- #
# Pallas kernel: one batch tile -> partial sums of (l1, l2, l3)
# --------------------------------------------------------------------------- #
def gcod_tile_kernel(acc_ref, nvalid_ref, u_ref, label_ref, logits_ref,
                     emb_ref, cent_ref, out_ref):
    acc = acc_ref[0, 0]              # atrain_overall_accuracy (SMEM scalar)
    n_valid = nvalid_ref[0, 0]       # number of real (unpadded) rows (SMEM)

    tile_b = logits_ref.shape[0]
    C = logits_ref.shape[1]

    # ---- in-kernel valid-row mask (no mask DMA, no wrapper pad of B) ---------
    row = pl.program_id(0) * tile_b + lax.broadcasted_iota(
        jnp.int32, (tile_b, 1), 0)
    valid = row < n_valid                                   # (tB,1) bool
    validf = valid.astype(jnp.float32)

    # Sanitize rows of a partial last tile with selects (stale/garbage VMEM in
    # the out-of-bounds region can never propagate NaN/Inf through a select).
    logits = jnp.where(valid, logits_ref[...].astype(jnp.float32), 0.0)
    emb = jnp.where(valid, emb_ref[...].astype(jnp.float32), 0.0)
    u = jnp.where(valid, u_ref[...], 0.5)
    label = jnp.where(valid, label_ref[...], 0)             # (tB,1) int32

    col = lax.broadcasted_iota(jnp.int32, (tile_b, C), 1)
    true_sel = (col == label).astype(jnp.float32)           # one-hot, in-kernel

    # ---- soft labels (unnormalized): s_exp / sum_s_exp ------------------------
    emb_sq = jnp.sum(emb * emb, axis=1, keepdims=True)                  # (tB,1)
    inv_norm = pl.reciprocal(jnp.sqrt(emb_sq) + EPS, approx=True)       # EUP
    emb_n = emb * inv_norm
    sim = jnp.dot(emb_n.astype(cent_ref.dtype), cent_ref[...],
                  preferred_element_type=jnp.float32)                   # (tB,C)
    s_max = jnp.max(sim, axis=1, keepdims=True)
    s_exp = jnp.exp(sim - s_max)
    sum_s_exp = jnp.sum(s_exp, axis=1, keepdims=True)
    inv_sum_s = pl.reciprocal(sum_s_exp, approx=True)                   # EUP

    # ---- shared logits statistics (reused by L1, L2 and L3) ------------------
    logit_max = jnp.max(logits, axis=1, keepdims=True)                  # (tB,1)
    l_exp = jnp.exp(logits - logit_max)                                 # (tB,C)
    sum_l_exp = jnp.sum(l_exp, axis=1, keepdims=True)                   # (tB,1)
    lse_logits = logit_max + jnp.log(sum_l_exp)
    true_logit = jnp.sum(logits * true_sel, axis=1, keepdims=True)      # (tB,1)

    # ---- L1: CE(soft_labels, log_softmax(logits + acc*u*y)) ------------------
    # mod_logits differs from logits only at the true class -> rank-1 lse update
    mod_true = true_logit + acc * u
    m_new = jnp.maximum(logit_max, mod_true)
    sum_mod = (sum_l_exp * jnp.exp(logit_max - m_new)
               - jnp.exp(true_logit - m_new)
               + jnp.exp(mod_true - m_new))
    lse_mod = m_new + jnp.log(sum_mod)
    # l1_per = lse_mod - sum(soft * mod_logits), soft = s_exp * inv_sum_s
    s_dot_logits = jnp.sum(s_exp * logits, axis=1, keepdims=True)
    s_exp_true = jnp.sum(s_exp * true_sel, axis=1, keepdims=True)
    l1_per = lse_mod - inv_sum_s * (s_dot_logits + acc * u * s_exp_true)

    # ---- L2: || onehot(argmax(logits)) + u*y - y ||^2 (closed form) ----------
    is_max = logits == logit_max
    first_idx = jnp.min(jnp.where(is_max, col, C), axis=1, keepdims=True)
    is_correct = (first_idx == label).astype(jnp.float32)
    l2_per = is_correct * (u * u) + (1.0 - is_correct) * (1.0 + (u - 1.0) ** 2)

    # ---- L3: KL-like term between p(true class) and sigmoid(-log u) ----------
    u_cl = jnp.clip(u, EPS, 1.0 - EPS)
    u_t = jnp.clip(jax.nn.sigmoid(-jnp.log(u_cl)), EPS, 1.0 - EPS)
    # p_true = softmax(logits)[true] = exp(logit_true - lse); exact for one-hot y
    p_true = jnp.clip(jnp.exp(true_logit - lse_logits), EPS, 1.0 - EPS)
    t1 = p_true * (jnp.log(p_true) - jnp.log(u_t))
    t2 = (1.0 - p_true) * (jnp.log(1.0 - p_true) - jnp.log(1.0 - u_t))
    dkl = t1 + t2
    finite = (dkl == dkl) & (jnp.abs(dkl) < jnp.inf)        # nan_to_num
    dkl = jnp.where(finite, dkl, 0.0)

    # ---- per-tile partial sums (padded / OOB rows masked out) ----------------
    l1_s = jnp.sum(l1_per * validf)
    l2_s = jnp.sum(l2_per * validf)
    l3_s = jnp.sum(dkl * validf)

    # Single lane-dense (1,8,128) store: lanes 0..2 carry (l1, l2, l3) partials.
    lane = lax.broadcasted_iota(jnp.int32, out_ref.shape, 2)
    out_ref[...] = jnp.where(lane == 0, l1_s,
                   jnp.where(lane == 1, l2_s,
                   jnp.where(lane == 2, l3_s, 0.0)))


# --------------------------------------------------------------------------- #
# Wrapper: tiling, VMEM budgeting, hoisted centroid norm, final reduction
# --------------------------------------------------------------------------- #
def _vmem_estimate_bytes(tile_b, C, D, stream_itemsize):
    stream = tile_b * (C * stream_itemsize     # logits
                       + D * stream_itemsize   # embeddings
                       + 4                     # u (f32)
                       + 4)                    # label (i32)
    resident = D * C * stream_itemsize         # centroids (kept resident)
    out = 8 * 128 * 4                          # partial-sum tile
    return 2 * (stream + resident + out)       # pipeline double-buffering


def _maybe_cast(x, dt):
    return x if x.dtype == dt else x.astype(dt)


def gcod_loss_pallas(acc, u_batch, logits, true_oh, emb_batch, centroids,
                     *, tile_b=512, use_bf16_matmul=False):
    B, C = logits.shape
    D = emb_batch.shape[1]

    stream_dt = jnp.bfloat16 if use_bf16_matmul else jnp.float32
    stream_itemsize = 2 if use_bf16_matmul else 4

    # Grid-invariant work hoisted out of the per-tile body: normalize centroids
    # once and present them in MXU-friendly (K, N) = (D, C) layout.
    centroids = _maybe_cast(centroids, jnp.float32)
    c_norm = jnp.sqrt(jnp.sum(centroids * centroids, axis=1, keepdims=True))
    safe_norm = jnp.where(c_norm == 0.0, jnp.ones_like(c_norm), c_norm)
    cent_nt = _maybe_cast((centroids / (safe_norm + EPS)).T, stream_dt)  # (D,C)

    # Streamed inputs: int32 labels instead of a dense f32 one-hot; no astype
    # when the dtype already matches; no wrapper-side padding of B (except a
    # tiny <8-row pad when B is not sublane-aligned).
    labels = jnp.argmax(true_oh, axis=1).astype(jnp.int32)[:, None]     # (B,1)
    u_b = _maybe_cast(u_batch, jnp.float32)
    logits_s = _maybe_cast(logits, stream_dt)
    emb_s = _maybe_cast(emb_batch, stream_dt)

    b8 = _round_up(B, 8)
    if b8 != B:                                   # rare: tiny sublane-align pad
        pad = b8 - B
        u_b = jnp.pad(u_b, ((0, pad), (0, 0)))
        labels = jnp.pad(labels, ((0, pad), (0, 0)))
        logits_s = jnp.pad(logits_s, ((0, pad), (0, 0)))
        emb_s = jnp.pad(emb_s, ((0, pad), (0, 0)))

    # Batch tile: multiple of 8, capped at b8, shrunk to fit the VMEM budget.
    tile_b = max(8, min(_round_up(tile_b, 8), b8))
    vmem_budget = 44 << 20                       # headroom under v7x's 64 MiB
    while tile_b > 8 and _vmem_estimate_bytes(tile_b, C, D,
                                              stream_itemsize) > vmem_budget:
        tile_b = max(8, _round_up(tile_b // 2, 8))
    # Keep >=2 grid steps when there is enough work so ("parallel",) can use
    # both TensorCores on v7x.
    if b8 >= 256 and pl.cdiv(b8, tile_b) < 2:
        tile_b = max(8, _round_up(pl.cdiv(b8, 2), 8))
    num_tiles = pl.cdiv(b8, tile_b)

    vmem_limit = int(min(max(_vmem_estimate_bytes(tile_b, C, D, stream_itemsize)
                             + (4 << 20), 32 << 20), 48 << 20))

    acc_arr = jnp.asarray(acc, jnp.float32).reshape(1, 1)
    nvalid_arr = jnp.full((1, 1), B, jnp.int32)

    grid_spec = pltpu.PrefetchScalarGridSpec(
        num_scalar_prefetch=0,
        grid=(num_tiles,),
        in_specs=[
            pl.BlockSpec(memory_space=pltpu.MemorySpace.SMEM),   # acc scalar
            pl.BlockSpec(memory_space=pltpu.MemorySpace.SMEM),   # n_valid (B)
            pl.BlockSpec((tile_b, 1), lambda i: (i, 0)),         # u_batch
            pl.BlockSpec((tile_b, 1), lambda i: (i, 0)),         # int32 labels
            pl.BlockSpec((tile_b, C), lambda i: (i, 0)),         # logits
            pl.BlockSpec((tile_b, D), lambda i: (i, 0)),         # embeddings
            pl.BlockSpec((D, C), lambda i: (0, 0)),              # centroids (resident)
        ],
        # One (8,128) lane-dense partial-sum tile per grid step.
        out_specs=pl.BlockSpec((1, 8, 128), lambda i: (i, 0, 0)),
    )

    partials = pl.pallas_call(
        gcod_tile_kernel,
        out_shape=jax.ShapeDtypeStruct((num_tiles, 8, 128), jnp.float32),
        grid_spec=grid_spec,
        compiler_params=pltpu.CompilerParams(
            dimension_semantics=("parallel",),   # batch tiles independent
            vmem_limit_bytes=vmem_limit,
        ),
    )(acc_arr, nvalid_arr, u_b, labels, logits_s, emb_s, cent_nt)

    # Finish the (tiny) reduction in JAX: sum per-tile partials, then means.
    sums = jnp.sum(partials[:, 0, :3], axis=0)                          # (3,)
    inv_b = 1.0 / B
    l1 = sums[0] * inv_b
    l2 = sums[1] * (inv_b / C)
    l3 = sums[2] * ((1.0 - jnp.asarray(acc, jnp.float32)) * inv_b)
    return l1, l2, l3


# --------------------------------------------------------------------------- #
# Glue: module state + centroid update (plain JAX / host)
# --------------------------------------------------------------------------- #
def update_centroids(u, prev_emb, class_bins, emb_dim):
    # mirrors gcodLoss._update_centroids (percent_cleanest = 50)
    # TODO(synk): ragged per-class top-k over dynamic bins has no clean Pallas
    # equivalent; kept as host/JAX glue (episodic, not the per-batch hot path).
    cents = []
    for idx in class_bins:
        if len(idx) == 0:
            cents.append(jnp.zeros((emb_dim,), jnp.float32))
            continue
        u_vals = u[idx, 0]                                   # (n,)
        k = min(max(1, int(len(idx) * 0.5)), len(idx))
        _, smallest_idx = lax.top_k(-u_vals, k)              # k smallest u
        clean = prev_emb[idx][smallest_idx]                  # (k, D)
        cents.append(jnp.mean(clean, axis=0))
    return jnp.stack(cents, axis=0).astype(jnp.float32)


def gcod_forward(batch_indices, logits, true_oh, emb_batch, acc,
                 u, prev_emb, class_bins, emb_dim):
    # prev_gnn_embeddings[batch_indices] = emb_batch   (functional update)
    prev_emb = prev_emb.at[jnp.asarray(batch_indices)].set(emb_batch)
    # first epoch / first batch -> centroid init (as in the PyTorch module)
    centroids = update_centroids(u, prev_emb, class_bins, emb_dim)
    u_batch = u[jnp.asarray(batch_indices)]                  # (B, 1)
    return gcod_loss_pallas(acc, u_batch, logits, true_oh, emb_batch, centroids)


# --------------------------------------------------------------------------- #
# Pure-JAX reference (tolerance check of the kernel path)
# --------------------------------------------------------------------------- #
def gcod_reference(acc, u_batch, logits, true_oh, emb_batch, centroids):
    emb_norm = jnp.linalg.norm(emb_batch, axis=1, keepdims=True)
    emb_n = emb_batch / (emb_norm + EPS)
    c_norm = jnp.linalg.norm(centroids, axis=1, keepdims=True)
    safe = jnp.where(c_norm == 0.0, jnp.ones_like(c_norm), c_norm)
    cent_n = centroids / (safe + EPS)
    soft = jax.nn.softmax(emb_n @ cent_n.T, axis=1)
    mod = logits + acc * u_batch * true_oh
    logp = jax.nn.log_softmax(mod, axis=1)
    l1 = jnp.mean(-jnp.sum(soft * logp, axis=1))
    C = logits.shape[1]
    pred = jax.nn.one_hot(jnp.argmax(logits, axis=1), C, dtype=jnp.float32)
    term = pred + u_batch * true_oh - true_oh
    l2 = jnp.mean(jnp.sum(term ** 2, axis=1)) / C
    u_cl = jnp.clip(u_batch[:, 0], EPS, 1.0 - EPS)
    u_t = jnp.clip(jax.nn.sigmoid(-jnp.log(u_cl)), EPS, 1.0 - EPS)
    p_true = jnp.clip(jnp.sum(jax.nn.softmax(logits, axis=1) * true_oh, axis=1),
                      EPS, 1.0 - EPS)
    dkl = (p_true * (jnp.log(p_true) - jnp.log(u_t))
           + (1.0 - p_true) * (jnp.log(1.0 - p_true) - jnp.log(1.0 - u_t)))
    dkl = jnp.nan_to_num(dkl, nan=0.0, posinf=0.0, neginf=0.0)
    l3 = jnp.mean(dkl) * (1.0 - acc)
    return l1, l2, l3


if __name__ == "__main__":
    num_examp, num_classes, emb_dim, batch = 64, 4, 32, 8

    key = jax.random.PRNGKey(0)
    k_u, k_prev, k_lab, k_log, k_emb = jax.random.split(key, 5)

    # deterministic parameter / state init (matches __init__ shapes)
    u = jnp.clip(0.001 * jax.random.normal(k_u, (num_examp, 1), jnp.float32),
                 EPS, 1.0 - EPS)
    prev_emb = jax.random.uniform(k_prev, (num_examp, emb_dim), jnp.float32) * 0.01
    sample_labels = np.asarray(
        jax.random.randint(k_lab, (num_examp,), 0, num_classes))
    class_bins = [np.where(sample_labels == i)[0] for i in range(num_classes)]

    # batch inputs
    batch_indices = np.arange(batch, dtype=np.int32)
    logits = jax.random.normal(k_log, (batch, num_classes), jnp.float32)
    emb_batch = jax.random.normal(k_emb, (batch, emb_dim), jnp.float32)
    labels_batch = sample_labels[batch_indices]
    true_oh = jax.nn.one_hot(labels_batch, num_classes, dtype=jnp.float32)
    atrain_overall_accuracy = 0.75

    l1, l2, l3 = gcod_forward(batch_indices, logits, true_oh, emb_batch,
                              atrain_overall_accuracy, u, prev_emb,
                              class_bins, emb_dim)
    jax.block_until_ready((l1, l2, l3))

    # tolerance check of the kernel against the pure-JAX reference
    prev_emb_ref = prev_emb.at[jnp.asarray(batch_indices)].set(emb_batch)
    centroids_ref = update_centroids(u, prev_emb_ref, class_bins, emb_dim)
    r1, r2, r3 = gcod_reference(atrain_overall_accuracy,
                                u[jnp.asarray(batch_indices)],
                                logits, true_oh, emb_batch, centroids_ref)
    np.testing.assert_allclose(np.array([l1, l2, l3]),
                               np.array([r1, r2, r3]),
                               rtol=1e-2, atol=2e-3)
    print("KERNEL_OK")
</pallas_src>

<mosaic_0001>
module attributes {stable_mosaic.version = 11 : i64} {
  func.func @gcod_tile_kernel(%arg0: i32, %arg1: memref<1x1xf32, #tpu.memory_space<smem>>, %arg2: memref<1x1xi32, #tpu.memory_space<smem>>, %arg3: memref<8x1xf32, #tpu.memory_space<vmem>>, %arg4: memref<8x1xi32, #tpu.memory_space<vmem>>, %arg5: memref<8x4xf32, #tpu.memory_space<vmem>>, %arg6: memref<8x32xf32, #tpu.memory_space<vmem>>, %arg7: memref<32x4xf32, #tpu.memory_space<vmem>>, %arg8: memref<1x8x128xf32, #tpu.memory_space<vmem>>) attributes {dimension_semantics = [#tpu.dimension_semantics<parallel>], iteration_bounds = array<i64: 1>, scalar_prefetch = 0 : i64, scratch_operands = 0 : i64, tpu.core_type = #tpu.core_type<tc>, window_params = [{transform_indices = @transform_0, window_bounds = array<i64: 1, 1>}, {transform_indices = @transform_1, window_bounds = array<i64: 1, 1>}, {transform_indices = @transform_2, window_bounds = array<i64: 8, 1>}, {transform_indices = @transform_3, window_bounds = array<i64: 8, 1>}, {transform_indices = @transform_4, window_bounds = array<i64: 8, 4>}, {transform_indices = @transform_5, window_bounds = array<i64: 8, 32>}, {pipeline_mode = #tpu.pipeline_mode<synchronous>, transform_indices = @transform_6, window_bounds = array<i64: 32, 4>}, {transform_indices = @transform_7, window_bounds = array<i64: 1, 8, 128>}]} {
    %c0 = arith.constant 0 : index
    %c0_0 = arith.constant 0 : index
    %0 = memref.load %arg1[%c0, %c0_0] : memref<1x1xf32, #tpu.memory_space<smem>>
    %c0_1 = arith.constant 0 : index
    %c0_2 = arith.constant 0 : index
    %1 = memref.load %arg2[%c0_1, %c0_2] : memref<1x1xi32, #tpu.memory_space<smem>>
    %c8_i32 = arith.constant 8 : i32
    %2 = arith.muli %arg0, %c8_i32 : i32
    %3 = tpu.iota {dimensions = array<i32: 0>} : vector<8x1xi32>
    %4 = vector.broadcast %2 : i32 to vector<8x1xi32>
    %5 = arith.addi %4, %3 : vector<8x1xi32>
    %6 = vector.broadcast %1 : i32 to vector<8x1xi32>
    %7 = arith.cmpi slt, %5, %6 : vector<8x1xi32>
    %8 = arith.extui %7 : vector<8x1xi1> to vector<8x1xi32>
    %9 = arith.sitofp %8 : vector<8x1xi32> to vector<8x1xf32>
    %c0_3 = arith.constant 0 : index
    %c0_4 = arith.constant 0 : index
    %10 = vector.load %arg5[%c0_3, %c0_4] : memref<8x4xf32, #tpu.memory_space<vmem>>, vector<8x4xf32>
    %cst = arith.constant 0.000000e+00 : f32
    %11 = vector.shape_cast %7 : vector<8x1xi1> to vector<8x1xi1>
    %12 = vector.broadcast %11 : vector<8x1xi1> to vector<8x4xi1>
    %13 = vector.broadcast %cst : f32 to vector<8x4xf32>
    %14 = arith.select %12, %10, %13 : vector<8x4xi1>, vector<8x4xf32>
    %c0_5 = arith.constant 0 : index
    %c0_6 = arith.constant 0 : index
    %15 = vector.load %arg6[%c0_5, %c0_6] : memref<8x32xf32, #tpu.memory_space<vmem>>, vector<8x32xf32>
    %cst_7 = arith.constant 0.000000e+00 : f32
    %16 = vector.shape_cast %7 : vector<8x1xi1> to vector<8x1xi1>
    %17 = vector.broadcast %16 : vector<8x1xi1> to vector<8x32xi1>
    %18 = vector.broadcast %cst_7 : f32 to vector<8x32xf32>
    %19 = arith.select %17, %15, %18 : vector<8x32xi1>, vector<8x32xf32>
    %c0_8 = arith.constant 0 : index
    %c0_9 = arith.constant 0 : index
    %20 = vector.load %arg3[%c0_8, %c0_9] : memref<8x1xf32, #tpu.memory_space<vmem>>, vector<8x1xf32>
    %cst_10 = arith.constant 5.000000e-01 : f32
    %21 = vector.broadcast %cst_10 : f32 to vector<8x1xf32>
    %22 = arith.select %7, %20, %21 : vector<8x1xi1>, vector<8x1xf32>
    %c0_11 = arith.constant 0 : index
    %c0_12 = arith.constant 0 : index
    %23 = vector.load %arg4[%c0_11, %c0_12] : memref<8x1xi32, #tpu.memory_space<vmem>>, vector<8x1xi32>
    %c0_i32 = arith.constant 0 : i32
    %24 = vector.broadcast %c0_i32 : i32 to vector<8x1xi32>
    %25 = arith.select %7, %23, %24 : vector<8x1xi1>, vector<8x1xi32>
    %26 = tpu.iota {dimensions = array<i32: 1>} : vector<8x4xi32>
    %27 = vector.broadcast %25 : vector<8x1xi32> to vector<8x4xi32>
    %28 = arith.cmpi eq, %26, %27 : vector<8x4xi32>
    %29 = arith.extui %28 : vector<8x4xi1> to vector<8x4xi32>
    %30 = arith.sitofp %29 : vector<8x4xi32> to vector<8x4xf32>
    %31 = arith.mulf %19, %19 : vector<8x32xf32>
    %cst_13 = arith.constant dense<0.000000e+00> : vector<8xf32>
    %32 = vector.multi_reduction <add>, %31, %cst_13 [1] : vector<8x32xf32> to vector<8xf32>
    %33 = vector.shape_cast %32 : vector<8xf32> to vector<8x1xf32>
    %34 = math.sqrt %33 : vector<8x1xf32>
    %cst_14 = arith.constant 1.000000e-07 : f32
    %35 = vector.broadcast %cst_14 : f32 to vector<8x1xf32>
    %36 = arith.addf %34, %35 : vector<8x1xf32>
    %37 = tpu.reciprocal %36 {approx = true} : vector<8x1xf32> -> vector<8x1xf32>
    %38 = vector.broadcast %37 : vector<8x1xf32> to vector<8x32xf32>
    %39 = arith.mulf %19, %38 : vector<8x32xf32>
    %c0_15 = arith.constant 0 : index
    %c0_16 = arith.constant 0 : index
    %40 = vector.load %arg7[%c0_15, %c0_16] : memref<32x4xf32, #tpu.memory_space<vmem>>, vector<32x4xf32>
    %cst_17 = arith.constant dense<0.000000e+00> : vector<8x4xf32>
    %41 = tpu.matmul %39, %40, %cst_17 {dimension_numbers = #tpu.dot_dimension_numbers<[1], [0], [0], [1], [0, 0, 1, 1], [], []>} : vector<8x32xf32>, vector<32x4xf32>, vector<8x4xf32> -> vector<8x4xf32>
    %cst_18 = arith.constant dense<0xFF800000> : vector<8xf32>
    %42 = vector.multi_reduction <maximumf>, %41, %cst_18 [1] : vector<8x4xf32> to vector<8xf32>
    %43 = vector.shape_cast %42 : vector<8xf32> to vector<8x1xf32>
    %44 = vector.broadcast %43 : vector<8x1xf32> to vector<8x4xf32>
    %45 = arith.subf %41, %44 : vector<8x4xf32>
    %46 = math.exp %45 : vector<8x4xf32>
    %cst_19 = arith.constant dense<0.000000e+00> : vector<8xf32>
    %47 = vector.multi_reduction <add>, %46, %cst_19 [1] : vector<8x4xf32> to vector<8xf32>
    %48 = vector.shape_cast %47 : vector<8xf32> to vector<8x1xf32>
    %49 = tpu.reciprocal %48 {approx = true} : vector<8x1xf32> -> vector<8x1xf32>
    %cst_20 = arith.constant dense<0xFF800000> : vector<8xf32>
    %50 = vector.multi_reduction <maximumf>, %14, %cst_20 [1] : vector<8x4xf32> to vector<8xf32>
    %51 = vector.shape_cast %50 : vector<8xf32> to vector<8x1xf32>
    %52 = vector.broadcast %51 : vector<8x1xf32> to vector<8x4xf32>
    %53 = arith.subf %14, %52 : vector<8x4xf32>
    %54 = math.exp %53 : vector<8x4xf32>
    %cst_21 = arith.constant dense<0.000000e+00> : vector<8xf32>
    %55 = vector.multi_reduction <add>, %54, %cst_21 [1] : vector<8x4xf32> to vector<8xf32>
    %56 = vector.shape_cast %55 : vector<8xf32> to vector<8x1xf32>
    %57 = math.log %56 : vector<8x1xf32>
    %58 = arith.addf %51, %57 : vector<8x1xf32>
    %59 = arith.mulf %14, %30 : vector<8x4xf32>
    %cst_22 = arith.constant dense<0.000000e+00> : vector<8xf32>
    %60 = vector.multi_reduction <add>, %59, %cst_22 [1] : vector<8x4xf32> to vector<8xf32>
    %61 = vector.shape_cast %60 : vector<8xf32> to vector<8x1xf32>
    %62 = vector.broadcast %0 : f32 to vector<8x1xf32>
    %63 = arith.mulf %62, %22 : vector<8x1xf32>
    %64 = arith.addf %61, %63 : vector<8x1xf32>
    %65 = arith.maximumf %51, %64 : vector<8x1xf32>
    %66 = arith.subf %51, %65 : vector<8x1xf32>
    %67 = math.exp %66 : vector<8x1xf32>
    %68 = arith.mulf %56, %67 : vector<8x1xf32>
    %69 = arith.subf %61, %65 : vector<8x1xf32>
    %70 = math.exp %69 : vector<8x1xf32>
    %71 = arith.subf %68, %70 : vector<8x1xf32>
    %72 = arith.subf %64, %65 : vector<8x1xf32>
    %73 = math.exp %72 : vector<8x1xf32>
    %74 = arith.addf %71, %73 : vector<8x1xf32>
    %75 = math.log %74 : vector<8x1xf32>
    %76 = arith.addf %65, %75 : vector<8x1xf32>
    %77 = arith.mulf %46, %14 : vector<8x4xf32>
    %cst_23 = arith.constant dense<0.000000e+00> : vector<8xf32>
    %78 = vector.multi_reduction <add>, %77, %cst_23 [1] : vector<8x4xf32> to vector<8xf32>
    %79 = vector.shape_cast %78 : vector<8xf32> to vector<8x1xf32>
    %80 = arith.mulf %46, %30 : vector<8x4xf32>
    %cst_24 = arith.constant dense<0.000000e+00> : vector<8xf32>
    %81 = vector.multi_reduction <add>, %80, %cst_24 [1] : vector<8x4xf32> to vector<8xf32>
    %82 = vector.shape_cast %81 : vector<8xf32> to vector<8x1xf32>
    %83 = vector.broadcast %0 : f32 to vector<8x1xf32>
    %84 = arith.mulf %83, %22 : vector<8x1xf32>
    %85 = arith.mulf %84, %82 : vector<8x1xf32>
    %86 = arith.addf %79, %85 : vector<8x1xf32>
    %87 = arith.mulf %49, %86 : vector<8x1xf32>
    %88 = arith.subf %76, %87 : vector<8x1xf32>
    %89 = vector.broadcast %51 : vector<8x1xf32> to vector<8x4xf32>
    %90 = arith.cmpf oeq, %14, %89 : vector<8x4xf32>
    %c4_i32 = arith.constant 4 : i32
    %91 = vector.broadcast %c4_i32 : i32 to vector<8x4xi32>
    %92 = arith.select %90, %26, %91 : vector<8x4xi1>, vector<8x4xi32>
    %cst_25 = arith.constant dense<2147483647> : vector<8xi32>
    %93 = vector.multi_reduction <minsi>, %92, %cst_25 [1] : vector<8x4xi32> to vector<8xi32>
    %94 = vector.shape_cast %93 : vector<8xi32> to vector<8x1xi32>
    %95 = arith.cmpi eq, %94, %25 : vector<8x1xi32>
    %96 = arith.extui %95 : vector<8x1xi1> to vector<8x1xi32>
    %97 = arith.sitofp %96 : vector<8x1xi32> to vector<8x1xf32>
    %98 = arith.mulf %22, %22 : vector<8x1xf32>
    %99 = arith.mulf %97, %98 : vector<8x1xf32>
    %cst_26 = arith.constant 1.000000e+00 : f32
    %100 = vector.broadcast %cst_26 : f32 to vector<8x1xf32>
    %101 = arith.subf %100, %97 : vector<8x1xf32>
    %cst_27 = arith.constant 1.000000e+00 : f32
    %102 = vector.broadcast %cst_27 : f32 to vector<8x1xf32>
    %103 = arith.subf %22, %102 : vector<8x1xf32>
    %104 = arith.mulf %103, %103 : vector<8x1xf32>
    %cst_28 = arith.constant 1.000000e+00 : f32
    %105 = vector.broadcast %cst_28 : f32 to vector<8x1xf32>
    %106 = arith.addf %105, %104 : vector<8x1xf32>
    %107 = arith.mulf %101, %106 : vector<8x1xf32>
    %108 = arith.addf %99, %107 : vector<8x1xf32>
    %cst_29 = arith.constant 1.000000e-07 : f32
    %cst_30 = arith.constant 0.99999988 : f32
    %109 = vector.broadcast %cst_29 : f32 to vector<8x1xf32>
    %110 = arith.maximumf %109, %22 : vector<8x1xf32>
    %111 = vector.broadcast %cst_30 : f32 to vector<8x1xf32>
    %112 = arith.minimumf %111, %110 : vector<8x1xf32>
    %113 = math.log %112 : vector<8x1xf32>
    %cst_31 = arith.constant 0.000000e+00 : f32
    %114 = vector.broadcast %cst_31 : f32 to vector<8x1xf32>
    %115 = arith.subf %114, %113 : vector<8x1xf32>
    %116 = arith.negf %115 : vector<8x1xf32>
    %117 = math.exp %116 : vector<8x1xf32>
    %cst_32 = arith.constant 1.000000e+00 : f32
    %118 = vector.broadcast %cst_32 : f32 to vector<8x1xf32>
    %119 = arith.addf %118, %117 : vector<8x1xf32>
    %120 = arith.divf %118, %119 : vector<8x1xf32>
    %cst_33 = arith.constant 1.000000e-07 : f32
    %cst_34 = arith.constant 0.99999988 : f32
    %121 = vector.broadcast %cst_33 : f32 to vector<8x1xf32>
    %122 = arith.maximumf %121, %120 : vector<8x1xf32>
    %123 = vector.broadcast %cst_34 : f32 to vector<8x1xf32>
    %124 = arith.minimumf %123, %122 : vector<8x1xf32>
    %125 = arith.subf %61, %58 : vector<8x1xf32>
    %126 = math.exp %125 : vector<8x1xf32>
    %cst_35 = arith.constant 1.000000e-07 : f32
    %cst_36 = arith.constant 0.99999988 : f32
    %127 = vector.broadcast %cst_35 : f32 to vector<8x1xf32>
    %128 = arith.maximumf %127, %126 : vector<8x1xf32>
    %129 = vector.broadcast %cst_36 : f32 to vector<8x1xf32>
    %130 = arith.minimumf %129, %128 : vector<8x1xf32>
    %131 = math.log %130 : vector<8x1xf32>
    %132 = math.log %124 : vector<8x1xf32>
    %133 = arith.subf %131, %132 : vector<8x1xf32>
    %134 = arith.mulf %130, %133 : vector<8x1xf32>
    %cst_37 = arith.constant 1.000000e+00 : f32
    %135 = vector.broadcast %cst_37 : f32 to vector<8x1xf32>
    %136 = arith.subf %135, %130 : vector<8x1xf32>
    %cst_38 = arith.constant 1.000000e+00 : f32
    %137 = vector.broadcast %cst_38 : f32 to vector<8x1xf32>
    %138 = arith.subf %137, %130 : vector<8x1xf32>
    %139 = math.log %138 : vector<8x1xf32>
    %cst_39 = arith.constant 1.000000e+00 : f32
    %140 = vector.broadcast %cst_39 : f32 to vector<8x1xf32>
    %141 = arith.subf %140, %124 : vector<8x1xf32>
    %142 = math.log %141 : vector<8x1xf32>
    %143 = arith.subf %139, %142 : vector<8x1xf32>
    %144 = arith.mulf %136, %143 : vector<8x1xf32>
    %145 = arith.addf %134, %144 : vector<8x1xf32>
    %146 = arith.cmpf oeq, %145, %145 : vector<8x1xf32>
    %147 = math.absf %145 : vector<8x1xf32>
    %cst_40 = arith.constant 0x7F800000 : f32
    %148 = vector.broadcast %cst_40 : f32 to vector<8x1xf32>
    %149 = arith.cmpf olt, %147, %148 : vector<8x1xf32>
    %150 = arith.andi %146, %149 : vector<8x1xi1>
    %cst_41 = arith.constant 0.000000e+00 : f32
    %151 = vector.broadcast %cst_41 : f32 to vector<8x1xf32>
    %152 = arith.select %150, %145, %151 : vector<8x1xi1>, vector<8x1xf32>
    %153 = arith.mulf %88, %9 : vector<8x1xf32>
    %154 = vector.shape_cast %153 : vector<8x1xf32> to vector<1x8x1xf32>
    %cst_42 = arith.constant dense<0.000000e+00> : vector<1xf32>
    %155 = vector.multi_reduction <add>, %154, %cst_42 [1, 2] : vector<1x8x1xf32> to vector<1xf32>
    %156 = vector.shape_cast %155 : vector<1xf32> to vector<1x1x1xf32>
    %157 = vector.extract %156[0, 0, 0] : f32 from vector<1x1x1xf32>
    %158 = arith.mulf %108, %9 : vector<8x1xf32>
    %159 = vector.shape_cast %158 : vector<8x1xf32> to vector<1x8x1xf32>
    %cst_43 = arith.constant dense<0.000000e+00> : vector<1xf32>
    %160 = vector.multi_reduction <add>, %159, %cst_43 [1, 2] : vector<1x8x1xf32> to vector<1xf32>
    %161 = vector.shape_cast %160 : vector<1xf32> to vector<1x1x1xf32>
    %162 = vector.extract %161[0, 0, 0] : f32 from vector<1x1x1xf32>
    %163 = arith.mulf %152, %9 : vector<8x1xf32>
    %164 = vector.shape_cast %163 : vector<8x1xf32> to vector<1x8x1xf32>
    %cst_44 = arith.constant dense<0.000000e+00> : vector<1xf32>
    %165 = vector.multi_reduction <add>, %164, %cst_44 [1, 2] : vector<1x8x1xf32> to vector<1xf32>
    %166 = vector.shape_cast %165 : vector<1xf32> to vector<1x1x1xf32>
    %167 = vector.extract %166[0, 0, 0] : f32 from vector<1x1x1xf32>
    %168 = tpu.iota {dimensions = array<i32: 2>} : vector<1x8x128xi32>
    %c0_i32_45 = arith.constant 0 : i32
    %169 = vector.broadcast %c0_i32_45 : i32 to vector<1x8x128xi32>
    %170 = arith.cmpi eq, %168, %169 : vector<1x8x128xi32>
    %c1_i32 = arith.constant 1 : i32
    %171 = vector.broadcast %c1_i32 : i32 to vector<1x8x128xi32>
    %172 = arith.cmpi eq, %168, %171 : vector<1x8x128xi32>
    %c2_i32 = arith.constant 2 : i32
    %173 = vector.broadcast %c2_i32 : i32 to vector<1x8x128xi32>
    %174 = arith.cmpi eq, %168, %173 : vector<1x8x128xi32>
    %cst_46 = arith.constant 0.000000e+00 : f32
    %175 = vector.broadcast %167 : f32 to vector<1x8x128xf32>
    %176 = vector.broadcast %cst_46 : f32 to vector<1x8x128xf32>
    %177 = arith.select %174, %175, %176 : vector<1x8x128xi1>, vector<1x8x128xf32>
    %178 = vector.broadcast %162 : f32 to vector<1x8x128xf32>
    %179 = arith.select %172, %178, %177 : vector<1x8x128xi1>, vector<1x8x128xf32>
    %180 = vector.broadcast %157 : f32 to vector<1x8x128xf32>
    %181 = arith.select %170, %180, %179 : vector<1x8x128xi1>, vector<1x8x128xf32>
    %c0_47 = arith.constant 0 : index
    %c0_48 = arith.constant 0 : index
    %c0_49 = arith.constant 0 : index
    %182 = vector.load %arg8[%c0_47, %c0_48, %c0_49] : memref<1x8x128xf32, #tpu.memory_space<vmem>>, vector<1x8x128xf32>
    tpu.vector_store %arg8[%c0_47, %c0_48, %c0_49], %181 {strides = array<i32>} : memref<1x8x128xf32, #tpu.memory_space<vmem>>, vector<1x8x128xf32>,
    return
  }
  func.func @transform_0(%arg0: i32) -> (i32, i32) {
    %c0_i32 = arith.constant 0 : i32
    %c0_i32_0 = arith.constant 0 : i32
    %c0_i32_1 = arith.constant 0 : i32
    return %c0_i32, %c0_i32_0 : i32, i32
  }
  func.func @transform_1(%arg0: i32) -> (i32, i32) {
    %c0_i32 = arith.constant 0 : i32
    %c0_i32_0 = arith.constant 0 : i32
    %c0_i32_1 = arith.constant 0 : i32
    return %c0_i32, %c0_i32_0 : i32, i32
  }
  func.func @transform_2(%arg0: i32) -> (i32, i32) {
    %c0_i32 = arith.constant 0 : i32
    %c0_i32_0 = arith.constant 0 : i32
    return %arg0, %c0_i32 : i32, i32
  }
  func.func @transform_3(%arg0: i32) -> (i32, i32) {
    %c0_i32 = arith.constant 0 : i32
    %c0_i32_0 = arith.constant 0 : i32
    return %arg0, %c0_i32 : i32, i32
  }
  func.func @transform_4(%arg0: i32) -> (i32, i32) {
    %c0_i32 = arith.constant 0 : i32
    %c0_i32_0 = arith.constant 0 : i32
    return %arg0, %c0_i32 : i32, i32
  }
  func.func @transform_5(%arg0: i32) -> (i32, i32) {
    %c0_i32 = arith.constant 0 : i32
    %c0_i32_0 = arith.constant 0 : i32
    return %arg0, %c0_i32 : i32, i32
  }
  func.func @transform_6(%arg0: i32) -> (i32, i32) {
    %c0_i32 = arith.constant 0 : i32
    %c0_i32_0 = arith.constant 0 : i32
    %c0_i32_1 = arith.constant 0 : i32
    return %c0_i32, %c0_i32_0 : i32, i32
  }
  func.func @transform_7(%arg0: i32) -> (i32, i32, i32) {
    %c0_i32 = arith.constant 0 : i32
    %c0_i32_0 = arith.constant 0 : i32
    %c0_i32_1 = arith.constant 0 : i32
    return %arg0, %c0_i32, %c0_i32_0 : i32, i32, i32
  }
}

</mosaic_0001>

<bundles_post_ra>
// kernel: tpu_custom_call.1
= control target key start
LH: loop header
LB: loop body
LE: loop exit
PB: predicated region body
PF: predicated region fallthrough
CT: control target
= control target key end

     0   :  { %v32_v0 = vlaneseq  ;;  %s597_s0 = inlined_call_operand.<no memory space> [shape: f32[1,1], index: 0, kind: input, shape index: {}]   ;;  %s598_s1 = inlined_call_operand.<no memory space> [shape: s32[1,1], index: 1, kind: input, shape index: {}]   ;;  %s599_s2 = inlined_call_operand.vmem [shape: f32[8,1], index: 2, kind: input, shape index: {}]   ;;  %s600_s3 = inlined_call_operand.vmem [shape: s32[8,1], index: 3, kind: input, shape index: {}]   ;;  %s601_s4 = inlined_call_operand.vmem [shape: f32[8,4], index: 4, kind: input, shape index: {}]   ;;  %s602_s5 = inlined_call_operand.vmem [shape: f32[8,32], index: 5, kind: input, shape index: {}]   ;;  %s603_s6 = inlined_call_operand.vmem [shape: f32[32,4], index: 6, kind: input, shape index: {}]   ;;  %s604_s7 = inlined_call_operand.hbm [shape: f32[1,8,128], index: 7, kind: output, shape index: {}]  }
   0x1   :  { %v36_v1 = vstv %s598_s1 }
   0x2   :  { %14 = vsyncpa [#allocation5], 0  ;;  %v33_v2 = vshrl.u32 %v32_v0, 7  ;;  %v43_v3 = vld [vmem:[%s602_s5] sm:$0xff]  ;;  %v423_v4 = vmov 0   ;;  %vm58_vm1 = vcmask 261120  }
   0x3   :  { %363 = vset.pattern.permute.xlu1 %v423_v4  ;;  %v47_v5 = vld [vmem:[%s600_s3] sm:$0xff]  ;;  %364 = vset.pattern.permute.xlu0 %v423_v4  ;;  %vm149_vm2 = vcmask 31744   ;;  %v75_v14 = vld [vmem:[%s603_s6 + $0x18] sm:$0xff]  ;;  %v424_v15 = vmov 0.0   ;;  %v74_v16 = vld [vmem:[%s603_s6 + $0x10] sm:$0xff]  ;;  %vm425_vm3 = vmmov 0  }
   0x4   :  { %vm476_vm0 = vcmp.lt.s32.totalorder %v33_v2, %v36_v1  ;;  %v40_v7 = vld [vmem:[%s601_s4] sm:$0xff]  ;;  %342 = vmatprep.subr.mxu0 %v424_v15  ;;  %350 = vmatprep.mubr.msk.f32.mxu0 %vm425_vm3, %v424_v15  ;;  %v73_v17 = vld [vmem:[%s603_s6 + $0x8] sm:$0xff]  ;;  %v514_v20 = vand.u32 127, %v32_v0  ;;  %vm274_vm11 = vcmask 7168   ;;  %s426_s17 = smov [#allocation4]  }
   0x5   :  { %v44_v8 = vsel %vm476_vm0, %v43_v3, 0.0  ;;  %v487_v9 = vsel %vm476_vm0, %v47_v5, 0  ;;  %v492_v11 = vsel %vm476_vm0, %v40_v7, 0.0  ;;  %343 = vmatpush3.msra.mxu0 %v75_v14  ;;  %v72_v18 = vld [vmem:[%s603_s6] sm:$0xff]  ;;  %s323_s18 = sshll.u32 %s426_s17, 4  ;;  %s324_s18 = int_to_ptr.vmem [resolvable:$true] %s323_s18 }
   0x6   :  { %v57_v10 = vmul.f32 %v44_v8, %v44_v8  ;;  %52 = vperm.xlu1 %363, %v487_v9   ;;  %v160_v13 = vsel %vm149_vm2, %v492_v11, -inf  ;;  %344 = vmatprep.subr.mxu0 %v424_v15  ;;  %v45_v42 = vld [vmem:[%s599_s2] sm:$0xff]  ;;  %vm309_vm14 = vcmp.eq.s32.totalorder %v514_v20, 2  ;;  %vm308_vm15 = vcmp.eq.s32.totalorder %v514_v20, 1  ;;  %s401_s19 = scalar_lea.vmem %s324_s18, 128  ;;  %p406_p1 = scmp.lt.s32.totalorder %s324_s18, %s324_s18 }
   0x7   :  { %345 = vmatpush3.msra.mxu0 %v74_v16  ;;  %v544_v43 = vsel %vm476_vm0, %v45_v42, 0.5  ;;  %p402_p0 = scmp.ne.s32.totalorder %s324_s18, %s401_s19  ;;  %p407_p2 = scmp.lt.s32.totalorder %s401_s19, %s401_s19 }
   0x8   :  { %v59_v12 = vsel %vm58_vm1, %v57_v10, 0.0  ;;  %346 = vmatprep.subr.mxu0 %v424_v15  ;;  %v235_v44 = vmax.f32 %v544_v43, 1e-07 }
   0x9   :  { %60 = vadd.xlane.f32.xlu0 %v59_v12  ;;  %347 = vmatpush3.msra.mxu0 %v73_v17  ;;  %p408_p3 = por %p407_p2, %p406_p1 }
   0xa   :  { %348 = vmatprep.subr.mxu0 %v424_v15  ;;  %v236_v45 = vmin.f32 %v235_v44, 0.9999999 }
   0xb   :  { %349 = vmatpush3.msra.mxu0 %v72_v18  ;;  %p409_p4 = pnand %p408_p3, %p402_p0 }
   0xd   :  { %161 = vmax.xlane.f32.xlu0 %v160_v13 }
  0x81   :  { %v53_v28 = vpop.permute.xlu1 %52 }
  0x82   :  { %vm54_vm5 = vcmp.eq.s32.totalorder %v514_v20, %v53_v28 }
  0x83   :  { %v532_v34 = vsel %vm54_vm5, 1.0, %v424_v15 }
  0x84   :  { %v172_v36 = vmul.f32 %v532_v34, %v492_v11 }
  0x86   :  { %v173_v39 = vsel %vm149_vm2, %v172_v36, 0.0 }
  0x92   :  { %v61_v19 = vpop.xlane.xlu0 %60 }
  0x93   :  { %365 = vrsqrt.f32 %v61_v19  ;;  %vm64_vm6 = vcmp.eq.f32.partialorder %v61_v19, inf  ;;  %v67_v31 = vand.u32 2147483648, %v61_v19  ;;  %vm66_vm7 = vcmp.eq.f32.partialorder %v61_v19, 0.0 }
  0x96   :  { %v516_v21 = vpop.xlane.xlu0 %161 }
  0x97   :  { %v163_v22 = vsub.f32 %v492_v11, %v516_v21  ;;  %vm207_vm4 = vcmp.eq.f32.partialorder %v492_v11, %v516_v21 }
  0x98   :  { %v208_v23 = vsel %vm207_vm4, %v514_v20, 4 }
  0x99   :  { %v164_v24 = vmul.f32 1.442695, %v163_v22  ;;  %v524_v25 = vsel %vm149_vm2, %v208_v23, 2147483647 }
  0x9a   :  { %v211_v26 = vshra.s32 %v524_v25, 16  ;;  %v210_v6 = vand.u32 65535, %v524_v25  ;;  %v176_v25 = vstv %s597_s0 }
  0x9b   :  { %367 = vpow2.f32 %v164_v24  ;;  %v559_v24 = vsel %vm476_vm0, 1.0, %v424_v15  ;;  %vm307_vm0 = vcmp.eq.s32.totalorder %v514_v20, 0 }
  0x9c   :  { %v527_v27 = vcvt.s32.f32 %v211_v26 }
  0x9e   :  { %214 = vmin.xlane.f32.xlu0 %v527_v27 }
  0xa0   :  { %v366_v29 = vpop.eup %365 }
  0xa1   :  { %v63_v30 = vmul.f32 %v366_v29, %v61_v19 }
  0xa3   :  { %v65_v32 = vsel %vm64_vm6, %v61_v19, %v63_v30 }
  0xa4   :  { %v68_v33 = vsel %vm66_vm7, %v67_v31, %v65_v32 }
  0xa5   :  { %v69_v35 = vadd.f32 1e-07, %v68_v33 }
  0xa7   :  { %369 = vrcp.f32 %v69_v35 }
  0xa8   :  { %v368_v37 = vpop.eup %367  ;;  %371 = vlog2.f32 %v236_v45 }
  0xa9   :  { %v166_v38 = vsel %vm149_vm2, %v368_v37, 0.0 }
  0xaa   :  { %167 = vadd.xlane.f32.xlu0 %v166_v38 }
  0xae   :  { %174 = vadd.xlane.f32.xlu0 %v173_v39  ;;  %v212_v39 = vcvt.s32.f32 %v210_v6 }
  0xb4   :  { %v370_v40 = vpop.eup %369 }
  0xb5   :  { %v71_v41 = vmul.f32 %v370_v40, %v44_v8  ;;  %v372_v46 = vpop.eup %371 }
  0xb6   :  { %v238_v47 = vmul.f32 0.6931472, %v372_v46  ;;  %v177_v46 = vmul.f32 %v176_v25, %v544_v43 }
  0xb7   :  { %351 = vmatmul.mubr.msk.f32.vlgmr.msra.gmra.mxu0 %vm58_vm1, %v71_v41 }
  0xb8   :  { %v239_v48 = vsub.f32 0.0, %v238_v47 }
  0xba   :  { %v336_v49 = vmul.f32 -1.442695, %v239_v48 }
  0xbc   :  { %373 = vpow2.f32 %v336_v49 }
  0xc9   :  { %v374_v52 = vpop.eup %373 }
  0xca   :  { %v243_v53 = vadd.f32 1.0, %v374_v52 }
 0x127   :  { %v547_v50 = vpop.xlane.xlu0 %214 }
 0x128   :  { %vm216_vm12 = vcmp.eq.f32.partialorder %v527_v27, %v547_v50 }
 0x129   :  { %v217_v40 = vsel %vm216_vm12, %v212_v39, inf }
 0x133   :  { %v549_v51 = vpop.xlane.xlu0 %167 }
 0x134   :  { %375 = vlog2.f32 %v549_v51 }
 0x135   :  { %377 = vrcp.f32 %v243_v53 }
 0x137   :  { %v553_v57 = vpop.xlane.xlu0 %174 }
 0x138   :  { %v178_v27 = vadd.f32 %v177_v46, %v553_v57 }
 0x13a   :  { %v179_v47 = vmax.f32 %v516_v21, %v178_v27 }
 0x13c   :  { %v184_v49 = vsub.f32 %v553_v57, %v179_v47  ;;  %v188_v52 = vsub.f32 %v178_v27, %v179_v47 }
 0x13e   :  { %v189_v53 = vmul.f32 1.442695, %v188_v52 }
 0x141   :  { %v376_v54 = vpop.eup %375 }
 0x142   :  { %v170_v55 = vmul.f32 0.6931472, %v376_v54  ;;  %v378_v60 = vpop.eup %377 }
 0x143   :  { %v246_v61 = vmax.f32 %v378_v60, 1e-07 }
 0x144   :  { %v171_v56 = vadd.f32 %v170_v55, %v516_v21 }
 0x145   :  { %v247_v62 = vmin.f32 %v246_v61, 0.9999999 }
 0x146   :  { %v248_v58 = vsub.f32 %v553_v57, %v171_v56  ;;  %v335_v57 = vadd.f32 -1.0, %v544_v43 }
 0x147   :  { %v262_v63 = vsub.f32 1.0, %v247_v62 }
 0x148   :  { %v249_v59 = vmul.f32 1.442695, %v248_v58 }
 0x14a   :  { %379 = vpow2.f32 %v249_v59 }
 0x14b   :  { %381 = vlog2.f32 %v247_v62 }
 0x14c   :  { %383 = vlog2.f32 %v262_v63 }
 0x157   :  { %v380_v0 = vpop.eup %379 }
 0x158   :  { %v251_v1 = vmax.f32 %v380_v0, 1e-07  ;;  %v382_v4 = vpop.eup %381 }
 0x159   :  { %v384_v5 = vpop.eup %383  ;;  %v256_v7 = vmul.f32 0.6931472, %v382_v4 }
 0x15a   :  { %v252_v2 = vmin.f32 %v251_v1, 0.9999999  ;;  %v264_v12 = vmul.f32 0.6931472, %v384_v5  ;;  %v231_v1 = vmul.f32 %v335_v57, %v335_v57 }
 0x15c   :  { %385 = vlog2.f32 %v252_v2  ;;  %v259_v3 = vsub.f32 1.0, %v252_v2 }
 0x15e   :  { %387 = vlog2.f32 %v259_v3 }
 0x169   :  { %v386_v8 = vpop.eup %385 }
 0x16a   :  { %v254_v10 = vmul.f32 0.6931472, %v386_v8 }
 0x16b   :  { %v388_v13 = vpop.eup %387 }
 0x16c   :  { %v257_v14 = vsub.f32 %v254_v10, %v256_v7  ;;  %v261_v16 = vmul.f32 0.6931472, %v388_v13 }
 0x16e   :  { %v258_v17 = vmul.f32 %v257_v14, %v252_v2  ;;  %v265_v18 = vsub.f32 %v261_v16, %v264_v12 }
 0x170   :  { %v266_v19 = vmul.f32 %v265_v18, %v259_v3 }
 0x172   :  { %v267_v22 = vadd.f32 %v266_v19, %v258_v17 }
 0x174   :  { %vm268_vm8 = vcmp.eq.f32.partialorder %v267_v22, %v267_v22  ;;  %v269_v23 = vand.u32 2147483647, %v267_v22 }
 0x176   :  { %vm270_vm9 = vcmp.lt.f32.partialorder %v269_v23, inf }
 0x177   :  { %v145_v26 = vpop.f32.mrf.mxu0  ;;  %vm271_vm10 = vmand %vm268_vm8, %vm270_vm9 }
 0x178   :  { %v150_v28 = vsel %vm149_vm2, %v145_v26, -inf  ;;  %v272_v29 = vsel %vm271_vm10, %v267_v22, 0.0 }
 0x179   :  { %151 = vmax.xlane.f32.xlu1 %v150_v28  ;;  %v352_v30 = vpop.f32.mrf.mxu0  ;;  %v296_v31 = vmul.f32 %v559_v24, %v272_v29 }
 0x17b   :  { %v297_v32 = vsel %vm274_vm11, %v296_v31, 0.0 }
 0x17d   :  { %298 = vadd.xlane.f32.xlu1 %v297_v32 }
 0x202   :  { %v152_v33 = vpop.xlane.xlu1 %151 }
 0x203   :  { %v153_v35 = vsub.f32 %v145_v26, %v152_v33 }
 0x205   :  { %v154_v36 = vmul.f32 1.442695, %v153_v35 }
 0x207   :  { %389 = vpow2.f32 %v154_v36 }
 0x214   :  { %v390_v37 = vpop.eup %389 }
 0x215   :  { %v156_v38 = vsel %vm149_vm2, %v390_v37, 0.0  ;;  %v199_v41 = vmul.f32 %v390_v37, %v532_v34  ;;  %v195_v44 = vmul.f32 %v390_v37, %v492_v11  ;;  %v180_v34 = vsub.f32 %v516_v21, %v179_v47 }
 0x216   :  { %157 = vadd.xlane.f32.xlu0 %v156_v38  ;;  %v185_v11 = vmul.f32 1.442695, %v184_v49  ;;  %v221_v21 = vcvt.f32.s32 %v547_v50  ;;  %v227_v50 = vmul.f32 %v544_v43, %v544_v43  ;;  %v299_v43 = vpop.xlane.xlu1 %298 }
 0x217   :  { %v200_v42 = vsel %vm149_vm2, %v199_v41, 0.0  ;;  %v196_v45 = vsel %vm149_vm2, %v195_v44, 0.0  ;;  %v181_v48 = vmul.f32 1.442695, %v180_v34  ;;  %v300_v29 = vrot.slane %v299_v43, 4 }
 0x218   :  { %v222_v63 = vshll.u32 %v221_v21, 16 }
 0x219   :  { %391 = vpow2.f32 %v181_v48  ;;  %v301_v30 = vadd.f32 %v300_v29, %v299_v43 }
 0x21a   :  { %218 = vmin.xlane.f32.xlu0 %v217_v40  ;;  %393 = vpow2.f32 %v185_v11 }
 0x21b   :  { %395 = vpow2.f32 %v189_v53  ;;  %v302_v35 = vrot.slane %v301_v30, 2 }
 0x21d   :  { %v303_v40 = vadd.f32 %v302_v35, %v301_v30 }
 0x21e   :  { %201 = vadd.xlane.f32.xlu0 %v200_v42 }
 0x222   :  { %197 = vadd.xlane.f32.xlu0 %v196_v45  ;;  %v304_v45 = vrot.slane %v303_v40, 1 }
 0x224   :  { %v305_v27 = vadd.f32 %v304_v45, %v303_v40 }
 0x226   :  { %v392_v54 = vpop.eup %391 }
 0x227   :  { %v183_v55 = vmul.f32 %v392_v54, %v549_v51  ;;  %v394_v56 = vpop.eup %393  ;;  %v232_v51 = vadd.f32 1.0, %v231_v1 }
 0x228   :  { %v396_v59 = vpop.eup %395 }
 0x229   :  { %v187_v58 = vsub.f32 %v183_v55, %v394_v56 }
 0x22b   :  { %v191_v60 = vadd.f32 %v396_v59, %v187_v58 }
 0x22d   :  { %397 = vlog2.f32 %v191_v60 }
 0x23a   :  { %v398_v3 = vpop.eup %397 }
 0x23b   :  { %v193_v10 = vmul.f32 0.6931472, %v398_v3 }
 0x23d   :  { %v194_v18 = vadd.f32 %v193_v10, %v179_v47 }
 0x29f   :  { %v158_v61 = vpop.xlane.xlu0 %157 }
 0x2a0   :  { %399 = vrcp.f32 %v158_v61 }
 0x2a3   :  { %v219_v62 = vpop.xlane.xlu0 %218 }
 0x2a4   :  { %v220_v0 = vcvt.f32.s32 %v219_v62 }
 0x2a6   :  { %v223_v2 = vadd.s32 %v222_v63, %v220_v0 }
 0x2a7   :  { %v202_v4 = vpop.xlane.xlu0 %201 }
 0x2a8   :  { %vm224_vm13 = vcmp.eq.s32.totalorder %v223_v2, %v487_v9  ;;  %v203_v8 = vmul.f32 %v202_v4, %v177_v46 }
 0x2a9   :  { %v334_v5 = vsel %vm224_vm13, 1.0, %v424_v15 }
 0x2aa   :  { %v229_v7 = vsub.f32 1.0, %v334_v5  ;;  %v228_v19 = vmul.f32 %v334_v5, %v227_v50 }
 0x2ab   :  { %v198_v12 = vpop.xlane.xlu0 %197 }
 0x2ac   :  { %v204_v13 = vadd.f32 %v203_v8, %v198_v12  ;;  %v233_v14 = vmul.f32 %v232_v51, %v229_v7 }
 0x2ad   :  { %v400_v16 = vpop.eup %399 }
 0x2ae   :  { %v205_v17 = vmul.f32 %v400_v16, %v204_v13  ;;  %v234_v23 = vadd.f32 %v233_v14, %v228_v19 }
 0x2b0   :  { %v206_v22 = vsub.f32 %v194_v18, %v205_v17  ;;  %v285_v15 = vmul.f32 %v559_v24, %v234_v23 }
 0x2b2   :  { %v273_v9 = vmul.f32 %v559_v24, %v206_v22  ;;  %v286_v28 = vsel %vm274_vm11, %v285_v15, 0.0 }
 0x2b4   :  { %v275_v26 = vsel %vm274_vm11, %v273_v9, 0.0 }
 0x2b5   :  { %276 = vadd.xlane.f32.xlu0 %v275_v26 }
 0x2b9   :  { %287 = vadd.xlane.f32.xlu0 %v286_v28 }
 0x33e   :  { %v277_v31 = vpop.xlane.xlu0 %276 }
 0x33f   :  { %v278_v32 = vrot.slane %v277_v31, 4 }
 0x341   :  { %v279_v33 = vadd.f32 %v278_v32, %v277_v31 }
 0x342   :  { %v288_v36 = vpop.xlane.xlu0 %287 }
 0x343   :  { %v280_v6 = vrot.slane %v279_v33, 2  ;;  %v289_v37 = vrot.slane %v288_v36, 4 }
 0x345   :  { %v290_v38 = vadd.f32 %v289_v37, %v288_v36  ;;  %v281_v39 = vadd.f32 %v280_v6, %v279_v33 }
 0x347   :  { %v291_v41 = vrot.slane %v290_v38, 2  ;;  %v282_v42 = vrot.slane %v281_v39, 1 }
 0x349   :  { %v292_v24 = vadd.f32 %v291_v41, %v290_v38  ;;  %v283_v44 = vadd.f32 %v282_v42, %v281_v39 }
 0x34b   :  { %353 = vpush %v283_v44  ;;  %v293_v25 = vrot.slane %v292_v24, 1 }
 0x34d   :  { %v294_v46 = vadd.f32 %v293_v25, %v292_v24 }
 0x34f   :  { %355 = vpush %v294_v46 }
 0x350   :  { %357 = vpush %v305_v27 }
 0x37c   :  { %s354_s0 = spop %353 }
 0x37d   :  { %v314_v49 = vstv %s354_s0 }
 0x380   :  { %s356_s15 = spop %355 }
 0x381   :  { %v312_v47 = vstv %s356_s15  ;;  %s358_s16 = spop %357 }
 0x382   :  { %v310_v34 = vstv %s358_s16 }
 0x383   :  { %v311_v48 = vsel %vm309_vm14, %v310_v34, 0.0 }
 0x384   :  { %v313_v11 = vsel %vm308_vm15, %v312_v47, %v311_v48 }
 0x385   :  { %v315_v52 = vsel %vm307_vm0, %v314_v49, %v313_v11 }
 0x386   :  { %316 = vst [vmem:[#allocation4] sm:$0xff] %v315_v52 }
 0x387   :  { %412 = shalt.err (!%p409_p4)
}
 0x388   :  { %326 = dma.vmem_to_hbm [thread:$0]  %s324_s18, 128, %s604_s7, [#allocation5]  }
 0x389   :  { %421 = dma.done.wait [#allocation5], 128  }
 0x38a   :  { %422 = vsyncadd [#allocation5], 4294967168 }
 0x38b   :  { %330 = vsyncpa [#allocation5], 1 }

</bundles_post_ra>
